<compile_context>
chip_gen: v7x
topology: tpu7x:2x2x1
jax: 0.10.0
libtpu: 0.0.40
codegen_flags: <defaults>
</compile_context>

<pallas_src>
import functools
import math

import numpy as np
import jax
import jax.numpy as jnp
from jax import lax
from jax.experimental import pallas as pl
from jax.experimental.pallas import tpu as pltpu


# ---------------------------------------------------------------------------
# Kernel 1: QKV projection (per (batch, n-tile, T-tile)); scale pre-folded.
# ---------------------------------------------------------------------------
def _qkv_proj_kernel(x_ref, w_ref, b_ref, qkv_ref):
    acc = jnp.dot(x_ref[0], w_ref[...], preferred_element_type=jnp.float32)
    qkv_ref[0] = (acc + b_ref[...]).astype(qkv_ref.dtype)       # (tm, tn)


# ---------------------------------------------------------------------------
# Kernel 2: flash attention + fused output projection.
#   grid = (B, num_q_tiles, num_kv_tiles); kv axis is the (innermost,
#   "arbitrary") reduction axis -- the scratch accumulators rely on this.
# ---------------------------------------------------------------------------
def _flash_attn_kernel(q_ref, k_ref, v_ref, wp_ref, bp_ref, o_ref,
                       m_sc, l_sc, acc_sc,
                       *, tq, tk, compute_dtype, recip_approx):
    qi = pl.program_id(1)
    ki = pl.program_id(2)
    q_start = qi * tq
    k_start = ki * tk

    @pl.when(ki == 0)
    def _init():
        m_sc[...] = jnp.full(m_sc.shape, -jnp.inf, dtype=m_sc.dtype)
        l_sc[...] = jnp.zeros(l_sc.shape, dtype=l_sc.dtype)
        acc_sc[...] = jnp.zeros(acc_sc.shape, dtype=acc_sc.dtype)

    def _scores():
        # q already carries the 1/sqrt(hd) scale (folded into W_qkv).
        # batched over heads, contraction on last dim (no transpose).
        return lax.dot_general(q_ref[0], k_ref[0],
                               (((2,), (2,)), ((0,), (0,))),
                               preferred_element_type=jnp.float32)  # (H,TQ,TK)

    def _flash_update(s):
        m_prev = m_sc[...]                                          # (H,TQ,1)
        m_new = jnp.maximum(m_prev, jnp.max(s, axis=-1, keepdims=True))
        alpha = jnp.exp(m_prev - m_new)
        p = jnp.exp(s - m_new)                                      # f32
        l_sc[...] = alpha * l_sc[...] + jnp.sum(p, axis=-1, keepdims=True)
        pv = lax.dot_general(p.astype(compute_dtype), v_ref[0],
                             (((2,), (1,)), ((0,), (0,))),
                             preferred_element_type=jnp.float32)    # (H,TQ,hd)
        acc_sc[...] = alpha * acc_sc[...] + pv
        m_sc[...] = m_new

    # Tile classification relative to the causal diagonal.
    fully_visible = (k_start + (tk - 1)) <= q_start                 # no mask
    diagonal = jnp.logical_and((k_start + (tk - 1)) > q_start,
                               k_start <= q_start + (tq - 1))       # partial
    # fully masked tiles (k_start > q_start + tq - 1): neither branch runs.

    @pl.when(fully_visible)
    def _full_tile():
        _flash_update(_scores())

    @pl.when(diagonal)
    def _diag_tile():
        s = _scores()
        # tile-local causal mask (O(TQ*TK)); only the diagonal tile pays it.
        # -1e30 (not -inf) is safe: the ki==0 tile always leaves column 0
        # unmasked for every row, so m is finite before any fully-masked row
        # of a later diagonal tile is processed.
        row = q_start + lax.broadcasted_iota(jnp.int32, (1, tq, tk), 1)
        col = k_start + lax.broadcasted_iota(jnp.int32, (1, tq, tk), 2)
        _flash_update(jnp.where(col <= row, s, jnp.float32(-1e30)))

    @pl.when(ki == pl.num_programs(2) - 1)
    def _finalize():
        inv_l = pl.reciprocal(l_sc[...], approx=recip_approx)       # (H,TQ,1)
        y = (acc_sc[...] * inv_l).astype(compute_dtype)             # (H,TQ,hd)
        # fused output projection: one batched matmul over heads + head-sum
        # (no per-head RMW loop over the (tq, C) accumulator).
        out = lax.dot_general(y, wp_ref[...],
                              (((2,), (1,)), ((0,), (0,))),
                              preferred_element_type=jnp.float32)   # (H,TQ,C)
        out = jnp.sum(out, axis=0) + bp_ref[...]                    # (TQ,C)
        o_ref[0] = out.astype(o_ref.dtype)


def _pick_tile(dim, target):
    """Largest tile <= target dividing dim; prefer multiples of 128, then 8."""
    if dim <= target:
        return dim
    for quantum in (128, 8, 1):
        t = (target // quantum) * quantum
        while t >= quantum:
            if dim % t == 0:
                return t
            t -= quantum
    return dim


def causal_self_attention(x, w_qkv, b_qkv, w_proj, b_proj, *, n_head,
                          compute_dtype=jnp.bfloat16,
                          q_tile=256, kv_tile=256, proj_n_tile=1024,
                          out_dtype=None,
                          vmem_limit_bytes=None):
    """Weights stored as (in_features, out_features): y = x @ W + b.

    Tuning notes (per review): on v5e/v6e (128 MiB VMEM) q_tile/kv_tile=512 is
    usually better for GPT-2-class shapes; on v7x (64 MiB VMEM) keep <=256 and
    leave vmem_limit_bytes at the compiler default.
    """
    B, T, C = x.shape
    assert C % n_head == 0
    hd = C // n_head
    out_dtype = x.dtype if out_dtype is None else out_dtype
    f32 = jnp.float32

    tm = _pick_tile(T, q_tile)   # T-tile for the QKV projection
    tq = _pick_tile(T, q_tile)   # query tile
    tk = _pick_tile(T, kv_tile)  # kv tile

    # Tile the QKV output-feature axis only when the resident weight would be
    # large (keeps small configs on the single-DMA resident-weight path).
    w_bytes = C * 3 * C * jnp.dtype(compute_dtype).itemsize
    tn = _pick_tile(3 * C, proj_n_tile) if w_bytes > 8 * 1024 * 1024 else 3 * C

    # Fold the attention scale 1/sqrt(hd) into the q-columns of W_qkv / b_qkv
    # (one-time wrapper-side op) -> no per-kv-step q rescale in the kernel.
    scale = 1.0 / math.sqrt(hd)
    col_scale = jnp.concatenate(
        [jnp.full((C,), scale, f32), jnp.ones((2 * C,), f32)])
    w_qkv = (jnp.asarray(w_qkv, f32) * col_scale).astype(compute_dtype)
    b_qkv = (jnp.asarray(b_qkv, f32) * col_scale).reshape(1, 3 * C)
    b_proj = jnp.asarray(b_proj, f32).reshape(1, C)
    recip_approx = bool(np.dtype(compute_dtype) != np.dtype(jnp.float32))

    qkv_params = pltpu.CompilerParams(
        dimension_semantics=("parallel", "parallel", "parallel"),
        vmem_limit_bytes=vmem_limit_bytes)
    attn_params = pltpu.CompilerParams(
        # kv must remain the innermost, "arbitrary" axis: the online-softmax
        # scratch accumulators carry across it (correctness depends on this).
        dimension_semantics=("parallel", "parallel", "arbitrary"),
        vmem_limit_bytes=vmem_limit_bytes)

    # --- 1) QKV projection: (B,T,C) @ (C,3C) + b -> (B,T,3C) -----------------
    qkv = pl.pallas_call(
        _qkv_proj_kernel,
        out_shape=jax.ShapeDtypeStruct((B, T, 3 * C), compute_dtype),
        grid=(B, (3 * C) // tn, T // tm),
        in_specs=[
            pl.BlockSpec((1, tm, C), lambda b, n, i: (b, i, 0)),
            pl.BlockSpec((C, tn), lambda b, n, i: (0, n)),
            pl.BlockSpec((1, tn), lambda b, n, i: (0, n)),
        ],
        out_specs=pl.BlockSpec((1, tm, tn), lambda b, n, i: (b, i, n)),
        compiler_params=qkv_params,
    )(x.astype(compute_dtype), w_qkv, b_qkv)

    # --- layout plumbing (wrapper-side, XLA): (B,T,3C) -> 3 x (B,H,T,hd) -----
    # TODO(synk): accepted extra HBM pass; see module docstring.
    qkv = qkv.reshape(B, T, 3, n_head, hd)
    qkv = jnp.transpose(qkv, (2, 0, 3, 1, 4))        # (3, B, H, T, hd)
    q, k, v = qkv[0], qkv[1], qkv[2]

    # output projection weight laid out per head: (C, C) -> (H, hd, C)
    wp = jnp.asarray(w_proj).reshape(n_head, hd, C).astype(compute_dtype)

    kernel = functools.partial(
        _flash_attn_kernel, tq=tq, tk=tk,
        compute_dtype=compute_dtype, recip_approx=recip_approx)

    # Last kv block that can hold unmasked (causal) columns for q-tile `qi`.
    # Above-diagonal grid steps clamp to it, so skipped steps trigger no new
    # k/v DMA (Pallas only re-fetches when the block index changes).
    def _kv_block(qi, ki):
        return jnp.minimum(ki, (qi * tq + (tq - 1)) // tk)

    # --- 2) flash attention + fused output projection ------------------------
    out = pl.pallas_call(
        kernel,
        out_shape=jax.ShapeDtypeStruct((B, T, C), out_dtype),
        grid=(B, T // tq, T // tk),
        in_specs=[
            pl.BlockSpec((1, n_head, tq, hd),
                         lambda b, qi, ki: (b, 0, qi, 0)),                    # q
            pl.BlockSpec((1, n_head, tk, hd),
                         lambda b, qi, ki: (b, 0, _kv_block(qi, ki), 0)),     # k
            pl.BlockSpec((1, n_head, tk, hd),
                         lambda b, qi, ki: (b, 0, _kv_block(qi, ki), 0)),     # v
            pl.BlockSpec((n_head, hd, C), lambda b, qi, ki: (0, 0, 0)),       # W_proj
            pl.BlockSpec((1, C), lambda b, qi, ki: (0, 0)),                   # b_proj
        ],
        out_specs=pl.BlockSpec((1, tq, C), lambda b, qi, ki: (b, qi, 0)),
        scratch_shapes=[
            pltpu.VMEM((n_head, tq, 1), jnp.float32),   # running max  m
            pltpu.VMEM((n_head, tq, 1), jnp.float32),   # running sum  l
            pltpu.VMEM((n_head, tq, hd), jnp.float32),  # output accumulator
        ],
        compiler_params=attn_params,
    )(q, k, v, wp, b_proj)

    return out


def _reference(x, w_qkv, b_qkv, w_proj, b_proj, n_head):
    """Plain-JAX reference mirroring the PyTorch forward (dropout = identity)."""
    B, T, C = x.shape
    hd = C // n_head
    qkv = x @ w_qkv + b_qkv.reshape(-1)
    q, k, v = qkv[..., :C], qkv[..., C:2 * C], qkv[..., 2 * C:]
    q = q.reshape(B, T, n_head, hd).transpose(0, 2, 1, 3)
    k = k.reshape(B, T, n_head, hd).transpose(0, 2, 1, 3)
    v = v.reshape(B, T, n_head, hd).transpose(0, 2, 1, 3)
    s = jnp.einsum("bhqd,bhkd->bhqk", q, k) / math.sqrt(hd)
    mask = jnp.tril(jnp.ones((T, T), dtype=bool))
    s = jnp.where(mask, s, -jnp.inf)
    p = jax.nn.softmax(s, axis=-1)
    y = jnp.einsum("bhqk,bhkd->bhqd", p, v)
    y = y.transpose(0, 2, 1, 3).reshape(B, T, C)
    return y @ w_proj + b_proj.reshape(-1)


if __name__ == "__main__":
    key = jax.random.PRNGKey(0)
    kx, k1, k2, k3, k4, kx2 = jax.random.split(key, 6)

    # Small config consistent with the module: B=2, T=8, n_embd=32, n_head=4.
    B, T, C, H = 2, 8, 32, 4
    x = jax.random.normal(kx, (B, T, C), dtype=jnp.float32)
    w_qkv = jax.random.normal(k1, (C, 3 * C), dtype=jnp.float32) * 0.1
    b_qkv = jax.random.normal(k2, (3 * C,), dtype=jnp.float32) * 0.1
    w_proj = jax.random.normal(k3, (C, C), dtype=jnp.float32) * 0.1
    b_proj = jax.random.normal(k4, (C,), dtype=jnp.float32) * 0.1

    ref = _reference(x, w_qkv, b_qkv, w_proj, b_proj, H)

    # f32 path (tight check)
    out_f32 = causal_self_attention(x, w_qkv, b_qkv, w_proj, b_proj,
                                    n_head=H, compute_dtype=jnp.float32)
    out_f32 = jax.block_until_ready(out_f32)
    assert out_f32.shape == (B, T, C)
    assert jnp.allclose(out_f32, ref, rtol=1e-4, atol=1e-5), "f32 mismatch"

    # bf16 fast path (f32 accumulation / softmax) — looser tolerance
    out_bf16 = causal_self_attention(x, w_qkv, b_qkv, w_proj, b_proj,
                                     n_head=H, compute_dtype=jnp.bfloat16)
    out_bf16 = jax.block_until_ready(out_bf16)
    assert jnp.allclose(out_bf16, ref, rtol=5e-2, atol=1e-2), "bf16 mismatch"

    # Multi-tile flash path: T=32 with 16-wide q/kv tiles -> 2x2 kv grid,
    # exercising online softmax across kv tiles, a full (unmasked) tile, the
    # diagonal (masked) tile and a skipped above-diagonal tile with clamped
    # k/v DMA indices.
    T2 = 32
    x2 = jax.random.normal(kx2, (B, T2, C), dtype=jnp.float32)
    ref2 = _reference(x2, w_qkv, b_qkv, w_proj, b_proj, H)
    out2 = causal_self_attention(x2, w_qkv, b_qkv, w_proj, b_proj, n_head=H,
                                 compute_dtype=jnp.float32,
                                 q_tile=16, kv_tile=16)
    out2 = jax.block_until_ready(out2)
    assert jnp.allclose(out2, ref2, rtol=1e-4, atol=1e-5), "multi-tile mismatch"

    print("KERNEL_OK")
</pallas_src>

<mosaic_0001>
module attributes {stable_mosaic.version = 11 : i64} {
  func.func @_qkv_proj_kernel(%arg0: i32, %arg1: i32, %arg2: i32, %arg3: memref<1x8x32xf32, #tpu.memory_space<vmem>>, %arg4: memref<32x96xf32, #tpu.memory_space<vmem>>, %arg5: memref<1x96xf32, #tpu.memory_space<vmem>>, %arg6: memref<1x8x96xf32, #tpu.memory_space<vmem>>) attributes {dimension_semantics = [#tpu.dimension_semantics<parallel>, #tpu.dimension_semantics<parallel>, #tpu.dimension_semantics<parallel>], iteration_bounds = array<i64: 2, 1, 1>, scalar_prefetch = 0 : i64, scratch_operands = 0 : i64, tpu.core_type = #tpu.core_type<tc>, window_params = [{transform_indices = @transform_0, window_bounds = array<i64: 1, 8, 32>}, {transform_indices = @transform_1, window_bounds = array<i64: 32, 96>}, {transform_indices = @transform_2, window_bounds = array<i64: 1, 96>}, {transform_indices = @transform_3, window_bounds = array<i64: 1, 8, 96>}]} {
    %c0 = arith.constant 0 : index
    %c0_0 = arith.constant 0 : index
    %c0_1 = arith.constant 0 : index
    %0 = vector.load %arg3[%c0, %c0_0, %c0_1] : memref<1x8x32xf32, #tpu.memory_space<vmem>>, vector<1x8x32xf32>
    %1 = vector.shape_cast %0 : vector<1x8x32xf32> to vector<8x32xf32>
    %c0_2 = arith.constant 0 : index
    %c0_3 = arith.constant 0 : index
    %2 = vector.load %arg4[%c0_2, %c0_3] : memref<32x96xf32, #tpu.memory_space<vmem>>, vector<32x96xf32>
    %cst = arith.constant dense<0.000000e+00> : vector<8x96xf32>
    %3 = tpu.matmul %1, %2, %cst {dimension_numbers = #tpu.dot_dimension_numbers<[1], [0], [0], [1], [0, 0, 1, 1], [], []>} : vector<8x32xf32>, vector<32x96xf32>, vector<8x96xf32> -> vector<8x96xf32>
    %c0_4 = arith.constant 0 : index
    %c0_5 = arith.constant 0 : index
    %4 = vector.load %arg5[%c0_4, %c0_5] : memref<1x96xf32, #tpu.memory_space<vmem>>, vector<1x96xf32>
    %5 = vector.broadcast %4 : vector<1x96xf32> to vector<8x96xf32>
    %6 = arith.addf %3, %5 : vector<8x96xf32>
    %c0_6 = arith.constant 0 : index
    %c0_7 = arith.constant 0 : index
    %c0_8 = arith.constant 0 : index
    %7 = vector.load %arg6[%c0_6, %c0_7, %c0_8] : memref<1x8x96xf32, #tpu.memory_space<vmem>>, vector<1x8x96xf32>
    %8 = vector.shape_cast %7 : vector<1x8x96xf32> to vector<8x96xf32>
    %9 = vector.shape_cast %6 : vector<8x96xf32> to vector<1x8x96xf32>
    tpu.vector_store %arg6[%c0_6, %c0_7, %c0_8], %9 {strides = array<i32>} : memref<1x8x96xf32, #tpu.memory_space<vmem>>, vector<1x8x96xf32>,
    return
  }
  func.func @transform_0(%arg0: i32, %arg1: i32, %arg2: i32) -> (i32, i32, i32) {
    %c0_i32 = arith.constant 0 : i32
    %c0_i32_0 = arith.constant 0 : i32
    return %arg0, %arg2, %c0_i32 : i32, i32, i32
  }
  func.func @transform_1(%arg0: i32, %arg1: i32, %arg2: i32) -> (i32, i32) {
    %c0_i32 = arith.constant 0 : i32
    %c0_i32_0 = arith.constant 0 : i32
    return %c0_i32, %arg1 : i32, i32
  }
  func.func @transform_2(%arg0: i32, %arg1: i32, %arg2: i32) -> (i32, i32) {
    %c0_i32 = arith.constant 0 : i32
    %c0_i32_0 = arith.constant 0 : i32
    return %c0_i32, %arg1 : i32, i32
  }
  func.func @transform_3(%arg0: i32, %arg1: i32, %arg2: i32) -> (i32, i32, i32) {
    %c0_i32 = arith.constant 0 : i32
    return %arg0, %arg2, %arg1 : i32, i32, i32
  }
}

</mosaic_0001>

<bundles_post_ra>
// kernel: tpu_custom_call.1
= control target key start
LH: loop header
LB: loop body
LE: loop exit
PB: predicated region body
PF: predicated region fallthrough
CT: control target
= control target key end

     0   :  { %8 = vsyncpa [#allocation3], 0  ;;  %s969_s0 = inlined_call_operand.hbm [shape: f32[2,8,32], index: 0, kind: input, shape index: {}]   ;;  %s970_s1 = inlined_call_operand.hbm [shape: f32[32,96], index: 1, kind: input, shape index: {}]   ;;  %s971_s2 = inlined_call_operand.vmem [shape: f32[1,96], index: 2, kind: input, shape index: {}]   ;;  %s972_s3 = inlined_call_operand.hbm [shape: f32[2,8,96], index: 3, kind: output, shape index: {}]  }
   0x1   :  { %10 = vsyncpa [#allocation3 + $0x1], 0 }
   0x2   :  { %11 = vsyncpa [#allocation6], 0 }
   0x3   :  { %12 = vsyncpa [#allocation4], 0 }
   0x4   :  { %14 = vsyncpa [#allocation4 + $0x1], 0  ;;  %s752_s12 = smov 0   ;;  %s754_s13 = smov 0  }
   0x5   :  { %s756_s14 = smov 0   ;;  %s758_s15 = smov 0  }
   0x6   :  { %s760_s16 = smov 0   ;;  %s762_s17 = smov 0  }
   0x7 LB: > { %s460_s18 = sadd.s32 4294967295, %s722_s17   ;;  %s461_s19 = sadd.s32 4294967294, %s722_s17   ;;  %s722_s17 = sphi %s762_s17, %s20_s17   ;;  %s718_s16 = sphi %s760_s16, %s996_s16   ;;  %s714_s15 = sphi %s758_s15, %s995_s15   ;;  %s710_s14 = sphi %s756_s14, %s994_s14   ;;  %s706_s13 = sphi %s754_s13, %s993_s13   ;;  %s702_s12 = sphi %s752_s12, %s992_s12  }
   0x8   : > { %p61_p0 = scmp.ne.s32.totalorder %s706_s13, %s702_s12  ;;  %p786_p1 = scmp.eq.s32.totalorder %s460_s18, 0 }
   0x9   : > { %p790_p2 = scmp.eq.s32.totalorder %s460_s18, 1  ;;  %p147_p3 = scmp.eq.s32.totalorder %s461_s19, 1 }
   0xa   : > { %s977_s20 = scalar_select %p786_p1, 1, 0 }
   0xb   : > { %s978_s21 = scalar_select %p790_p2, 1, 0 }
   0xc   : > { %p796_p4 = por %p786_p1, %p61_p0  ;;  %p462_p5 = scmp.ge.s32.totalorder %s722_s17, 1 }
   0xd   : > { %p801_p6 = por %p147_p3, %p61_p0  ;;  %p154_p7 = scmp.lt.s32.totalorder %s722_s17, 3 }
   0xe   : > { %s979_s22 = scalar_select %p796_p4, 1, 0 }
   0xf   : > { %s980_s23 = scalar_select %p801_p6, 1, 0 }
  0x10   : > { %p806_p8 = pnand %p462_p5, %p154_p7  ;;  %s724_s25 = smov [#allocation5]  }
  0x11   : > { %s168_s26 = sshll.u32 %s724_s25, 4  ;;  %s39_s28 = sadd.s32 1, %s718_s16  ;;  %s169_s26 = int_to_ptr.vmem [resolvable:$true] %s168_s26 }
  0x12   : > { %s981_s24 = scalar_select %p806_p8, 1, 0 }
  0x13   : > { %p508_p9 = pneg %p806_p8  ;;  %s578_s4 = scalar_lea.hbm %s970_s1, 512 }
  0x14   : > { %p579_p12 = scmp.ne.s32.totalorder %s970_s1, %s578_s4  ;;  %p585_p5 = scmp.lt.u32.totalorder %s578_s4, %s970_s1 }
  0x15   : > { %p815_p11 = pnand %p508_p9, %p786_p1 }
  0x17   : > { %p580_p13 = pneg %p815_p11 }
  0x19   : > { %p581_p0 = pnand %p580_p13, %p579_p12 }
  0x1b   : > { %p582_p3 = pneg %p581_p0 }
  0x1d   : > { %p587_p7 = pnand %p585_p5, %p582_p3 }
  0x1f   : > { %590 = shalt.err (!%p587_p7)
}
  0x20   : > { %s591_s9 = scalar_lea.vmem %s169_s26, 512  ;;  %p599_p1 = scmp.lt.s32.totalorder %s169_s26, %s169_s26 }
  0x21   : > { %p592_p9 = scmp.ne.s32.totalorder %s169_s26, %s591_s9  ;;  %p600_p4 = scmp.lt.s32.totalorder %s591_s9, %s591_s9 }
  0x23   : > { %p594_p10 = pnand %p592_p9, %p580_p13  ;;  %p601_p8 = por %p600_p4, %p599_p1 }
  0x25   : > { %p595_p6 = pneg %p594_p10 }
  0x27   : > { %p602_p2 = pnand %p601_p8, %p595_p6 }
  0x29   : > { %605 = shalt.err (!%p602_p2)
}
  0x2a   : > { %s725_s10 = smov 128   ;;  %s726_s11 = smov 8  }
  0x2b   : > { %511 = dma.hbm_to_vmem [thread:$0]  (!%p815_p11), %s970_s1, 512, %s169_s26, [#allocation6], %s725_s10, %s725_s10, %s726_s11  }
  0x2c   : > { %p41_p1 = scmp.ge.s32.totalorder %s39_s28, 2  ;;  %s48_s25 = sadd.s32 1, %s710_s14 }
  0x2d   : > { %p55_p2 = scmp.ne.s32.totalorder %s710_s14, %s706_s13  ;;  %p56_p4 = scmp.eq.s32.totalorder %s722_s17, 0 }
  0x2e   : > { %s998_s28 = smov (%p41_p1, %s39_s28), 0  ;;  %p984_p8 = scmp.ne.s32.totalorder %s978_s21, 0 }
  0x2f   : > { %p842_p6 = por %p56_p4, %p55_p2  ;;  %s43_s27 = ssub.s32 %s718_s16, %s998_s28 }
  0x30   : > { %p848_p10 = por %p984_p8, %p55_p2  ;;  %p521_p12 = scmp.lt.s32.totalorder %s722_s17, 2 }
  0x31   : > { %p46_p11 = scmp.eq.s32.totalorder %s43_s27, 0  ;;  %s188_s26 = sand.u32 1, %s710_s14  }
  0x32   : > { %s466_s4 = sshll.u32 %s188_s26, 3  ;;  %s467_s6 = sshll.u32 %s718_s16, 7 }
  0x33   : > { %s857_s5 = scalar_select %p46_p11, %s710_s14, %s48_s25  }
  0x34   : > { %s863_s9 = scalar_lea.hbm %s969_s0, %s467_s6  ;;  %s192_s21 = scalar_lea.vmem [#allocation2], %s466_s4 }
  0x35   : > { %s200_s10 = sshll.u32 %s192_s21, 4  ;;  %p869_p13 = pnand %p521_p12, %p842_p6  ;;  %s865_s10 = int_to_ptr.vmem [resolvable:$true] %s200_s10 }
  0x36   : > { %s189_s18 = scalar_lea.sflag [#allocation3], %s188_s26  ;;  %s606_s19 = scalar_lea.hbm %s863_s9, 128 }
  0x37   : > { %p607_p0 = scmp.ne.s32.totalorder %s863_s9, %s606_s19  ;;  %p608_p3 = pneg %p869_p13 }
  0x38   : > { %s611_s4 = scalar_lea.hbm %s969_s0, 256  ;;  %p612_p9 = scmp.lt.u32.totalorder %s863_s9, %s969_s0 }
  0x39   : > { %p609_p5 = pnand %p608_p3, %p607_p0  ;;  %p613_p1 = scmp.lt.u32.totalorder %s611_s4, %s606_s19 }
  0x3a   : > { %p615_p4 = scmp.lt.u32.totalorder %s606_s19, %s863_s9 }
  0x3b   : > { %p610_p7 = pneg %p609_p5  ;;  %p614_p2 = por %p613_p1, %p612_p9 }
  0x3d   : > { %p616_p6 = por %p615_p4, %p614_p2 }
  0x3f   : > { %p617_p8 = pnand %p616_p6, %p610_p7 }
  0x41   : > { %620 = shalt.err (!%p617_p8)
}
  0x42   : > { %s621_s26 = scalar_lea.vmem %s865_s10, 128  ;;  %s727_s7 = smov [#allocation2]  }
  0x43   : > { %p622_p12 = scmp.ne.s32.totalorder %s865_s10, %s621_s26  ;;  %s626_s8 = sshll.u32 %s727_s7, 4  ;;  %s627_s8 = int_to_ptr.vmem [resolvable:$false] %s626_s8 }
  0x44   : > { %s628_s21 = scalar_lea.vmem %s627_s8, 256  ;;  %p629_p5 = scmp.lt.s32.totalorder %s865_s10, %s627_s8 }
  0x45   : > { %p624_p11 = pnand %p622_p12, %p608_p3  ;;  %p630_p9 = scmp.lt.s32.totalorder %s628_s21, %s621_s26 }
  0x47   : > { %p625_p0 = pneg %p624_p11  ;;  %p631_p1 = por %p630_p9, %p629_p5 }
  0x49   : > { %p632_p2 = pnand %p631_p1, %p625_p0 }
  0x4b   : > { %635 = shalt.err (!%p632_p2)
}
  0x4c   : > { %515 = dma.hbm_to_vmem [thread:$0]  (!%p869_p13), %s863_s9, 128, %s865_s10, %s189_s18  }
  0x4d   : > { %p987_p7 = scmp.ne.s32.totalorder %s981_s24, 0 }
  0x4e   : > { %s901_s19 = sand.u32 (!%p987_p7), 1, %s706_s13   ;;  %p988_p3 = scmp.ne.s32.totalorder (!%p987_p7), %s979_s22, 0 }
  0x4f   : > { %209 = sbr.rel (%p987_p7) target bundleno = 329 (0x149), region = 32  ;;  %s469_s25 = sshll.u32 (!%p987_p7), %s901_s19, 3 }
  0x50   : > { %s212_s27 = scalar_lea.sflag (!%p987_p7), [#allocation3], %s901_s19  ;;  %s215_s4 = scalar_lea.vmem (!%p987_p7), [#allocation2], %s469_s25 }
  0x56   : > { %689 = dma.done.wait (%p988_p3), %s212_s27, 128  }
  0x57   : > { %691 = vsyncadd (%p988_p3), %s212_s27, 4294967168  ;;  %p989_p4 = scmp.ne.s32.totalorder %s977_s20, 0 }
  0x59   : > { %693 = dma.done.wait (%p989_p4), [#allocation6], 512  }
  0x5a   : > { %695 = vsyncadd (%p989_p4), [#allocation6], 4294966784  ;;  %v728_v0 = vmov 0.0|0.0   ;;  %vm729_vm0 = vmmov 0   ;;  %v730_v1 = vmov 0.0   ;;  %v249_v2 = vld [vmem:[#allocation5] sm:$0xff] }
  0x5b   : > { %494 = vmatprep.subr.bf16.mxu0 %v728_v0  ;;  %491 = vmatprep.mubr.msk.f32.mxu0 %vm729_vm0, %v730_v1  ;;  %v250_v3 = vld [vmem:[#allocation5 + $0x8] sm:$0xff]  ;;  %v251_v4 = vld [vmem:[#allocation5 + $0x10] sm:$0xff]  ;;  %v252_v6 = vld [vmem:[#allocation5 + $0x18] sm:$0xff]  ;;  %vm260_vm1 = vcmask 261120   ;;  %s475_s24 = sshll.u32 %s714_s15, 7  ;;  %s244_s9 = scalar_lea.vmem [#allocation7], %s469_s25 }
  0x5c   : > { %v495_v5 = vpack.c.bf16 %v250_v3, %v249_v2  ;;  %v498_v7 = vpack.c.bf16 %v252_v6, %v251_v4  ;;  %v248_v8 = vld [vmem:[%s215_s4] sm:$0xff]  ;;  %s352_s10 = sshll.u32 %s244_s9, 4  ;;  %vm334_vm2 = vcmask 785408   ;;  %s920_s29 = scalar_lea.hbm %s972_s3, %s475_s24  ;;  %s922_s10 = int_to_ptr.vmem [resolvable:$true] %s352_s10 }
  0x5d   : > { %v472_v9 = vld [vmem:[%s971_s2] ss:$0 sm:$0xff]  ;;  %s337_s6 = scalar_lea.sflag [#allocation4], %s901_s19  ;;  %s636_s26 = scalar_lea.vmem %s922_s10, 128 }
  0x5e   : > { %496 = vmatpush3.bf16.msra.mxu0 %v495_v5  ;;  %p637_p13 = scmp.ne.s32.totalorder %s922_s10, %s636_s26  ;;  %s731_s15 = smov [#allocation7]  }
  0x5f   : > { %497 = vmatprep.subr.bf16.mxu0 %v728_v0  ;;  %s640_s7 = sshll.u32 %s731_s15, 4  ;;  %s641_s7 = int_to_ptr.vmem [resolvable:$false] %s640_s7 }
  0x60   : > { %p638_p6 = pnand %p637_p13, %p848_p10  ;;  %s642_s8 = scalar_lea.vmem %s641_s7, 256 }
  0x61   : > { %p643_p12 = scmp.lt.s32.totalorder %s922_s10, %s641_s7  ;;  %p644_p11 = scmp.lt.s32.totalorder %s642_s8, %s636_s26 }
  0x62   : > { %499 = vmatpush3.bf16.msra.mxu0 %v498_v7  ;;  %p639_p8 = pneg %p638_p6 }
  0x63   : > { %p645_p0 = por %p644_p11, %p643_p12 }
  0x65   : > { %492 = vmatmul.mubr.msk.f32.vlgmr.msra.gmra.mrb[0].mxu0 %vm260_vm1, %v248_v8  ;;  %p646_p5 = pnand %p645_p0, %p639_p8 }
 0x138   : > { %v330_v10 = vpop.f32.mrb[0].mxu0 }
 0x139   : > { %v331_v11 = vadd.f32 %v472_v9, %v330_v10  ;;  %v493_v12 = vpop.f32.mrb[1].mxu0 }
 0x13b   : > { %335 = vst.msk [vmem:[%s244_s9] sm:$0xff] %vm334_vm2, %v331_v11 }
 0x13c   : > { %649 = shalt.err (!%p646_p5)
}
 0x13d   : > { %s650_s21 = scalar_lea.hbm %s920_s29, 128  ;;  %s654_s27 = scalar_lea.hbm %s972_s3, 256 }
 0x13e   : > { %p651_p9 = scmp.ne.s32.totalorder %s920_s29, %s650_s21  ;;  %p655_p7 = scmp.lt.u32.totalorder %s920_s29, %s972_s3 }
 0x13f   : > { %p656_p3 = scmp.lt.u32.totalorder %s654_s27, %s650_s21  ;;  %p658_p13 = scmp.lt.u32.totalorder %s650_s21, %s920_s29 }
 0x140   : > { %p652_p1 = pnand %p651_p9, %p848_p10 }
 0x141   : > { %p657_p4 = por %p656_p3, %p655_p7 }
 0x142   : > { %p653_p2 = pneg %p652_p1 }
 0x143   : > { %p659_p6 = por %p658_p13, %p657_p4 }
 0x145   : > { %p660_p8 = pnand %p659_p6, %p653_p2 }
 0x147   : > { %663 = shalt.err (!%p660_p8)
}
 0x148   : > { %506 = dma.vmem_to_hbm [thread:$0]  (%p848_p10), %s922_s10, 128, %s920_s29, %s337_s6  }
 0x149 PF: > { %s364_s22 = sand.u32 1, %s702_s12   ;;  %p990_p12 = scmp.ne.s32.totalorder %s980_s23, 0 }
 0x14a   : > { %p991_p11 = scmp.ge.s32.totalorder %s722_s17, 2  ;;  %s365_s24 = scalar_lea.sflag [#allocation4], %s364_s22 }
 0x14c   : > { %p517_p0 = pnand %p991_p11, %p990_p12 }
 0x14e   : > { %697 = dma.done.wait (!%p517_p0), %s365_s24, 128  }
 0x14f   : > { %699 = vsyncadd (!%p517_p0), %s365_s24, 4294967168  ;;  %s20_s17 = sadd.s32 1, %s722_s17   ;;  %s992_s12 = smov %s706_s13 }
 0x150   : > { %p17_p5 = scmp.ge.s32.totalorder %s20_s17, 4   ;;  %s993_s13 = smov %s710_s14 }
 0x151   : > { %s994_s14 = smov %s857_s5  ;;  %s995_s15 = smov %s718_s16 }
 0x152   : > { %s996_s16 = smov %s998_s28  ;;  %19 = sbr.rel (!%p17_p5) target bundleno = 7 (0x7), region = 85 }
 0x159   :  { %370 = vsyncpa [#allocation3], 1 }
 0x15a   :  { %372 = vsyncpa [#allocation3 + $0x1], 1 }
 0x15b   :  { %373 = vsyncpa [#allocation6], 1 }
 0x15c   :  { %374 = vsyncpa [#allocation4], 1 }
 0x15d   :  { %376 = vsyncpa [#allocation4 + $0x1], 1 }

</bundles_post_ra>
